<compile_context>
chip_gen: v7x
topology: tpu7x:2x2x1
jax: 0.10.0
libtpu: 0.0.40
codegen_flags: <defaults>
</compile_context>

<pallas_src>
import numpy as np
import jax
import jax.numpy as jnp
from jax.experimental import pallas as pl
from jax.experimental.pallas import tpu as pltpu

DIM_ = 15          # intermediate / loc dimension (hard-coded in the module)
N_PER_COL = 2      # number of 1s per column of the binary projection
LOG_2PI = float(np.log(2.0 * np.pi))
LOG_HALF = float(np.log(0.5))
# entropy elementwise const: 0.5 + 0.5*log(2pi) + log(0.5)   (log(scale)=log_scale+log(0.5))
ENT_CONST = 0.5 + 0.5 * LOG_2PI + LOG_HALF
# log-prob summed const: sum over DIM_ of (log(0.5) + 0.5*log(2pi))
LOGP_CONST = DIM_ * (LOG_HALF + 0.5 * LOG_2PI)

# Safe on all generations: <= v7x 64 MiB/TC physical, raises v5e/v6e scoped defaults.
VMEM_LIMIT_BYTES = 48 << 20


def _gen_binary_mat(K, N, d, seed=0):
    """Deterministic re-implementation of the module's _gen_binary_mat."""
    rng = np.random.default_rng(seed)
    idx = list(range(K))
    mat = np.zeros((K, N))
    while np.linalg.matrix_rank(mat) != K:
        mat[:] = 0
        chosen = []
        for i in range(N):
            t = tuple(map(int, rng.choice(idx, size=d, replace=False)))
            while t in chosen:
                t = tuple(map(int, rng.choice(idx, size=d, replace=False)))
            chosen.append(t)
            mat[t, i] = 1.0 / np.sqrt(d)
    assert np.allclose(np.linalg.norm(mat, axis=0), 1.0)
    return mat.astype(np.float32)


def _round_up(x, m):
    return ((x + m - 1) // m) * m


def init_actor_params(key, in_dim, action_dim, hidden_dim=8):
    ks = jax.random.split(key, 8)

    def lin(kw, kb, fan_in, fan_out):
        bound = 1.0 / np.sqrt(fan_in)
        w = jax.random.uniform(kw, (fan_in, fan_out), jnp.float32, -bound, bound)
        b = jax.random.uniform(kb, (1, fan_out), jnp.float32, -bound, bound)
        return w, b

    w1, b1 = lin(ks[0], ks[1], in_dim, DIM_)
    w2, b2 = lin(ks[2], ks[3], DIM_, hidden_dim)
    w3, b3 = lin(ks[4], ks[5], hidden_dim, DIM_)
    w4, b4 = lin(ks[6], ks[7], DIM_, 2 * DIM_)
    proj = jnp.asarray(_gen_binary_mat(DIM_, action_dim, N_PER_COL, seed=0))
    # fold 1/sqrt(n_per_col) into the projection used by the kernel
    proj_scaled = proj * jnp.float32(1.0 / np.sqrt(N_PER_COL))
    return dict(w1=w1, b1=b1, w2=w2, b2=b2, w3=w3, b3=b3, w4=w4, b4=b4,
                proj=proj, proj_scaled=proj_scaled)


def _choose_block_rows(M, block_rows=None):
    """Pick the row tile from a VMEM budget, keep >=2 blocks for megacore."""
    if block_rows is None:
        # ~7-9 KiB VMEM per row (double-buffered 128-lane-padded in/out streams
        # plus ~10 in-kernel (bm, <=128) f32 temporaries) -> 2048 rows stays
        # well under the 48 MiB limit on every generation while being large
        # enough (>=512) to sit near the HBM roofline.
        block_rows = 2048
    bm = min(block_rows, _round_up(max(M, 1), 8))
    bm = _round_up(bm, 8)
    m_pad = _round_up(max(M, 1), bm)
    # Ensure the 'parallel' row axis has >=2 blocks so both v7x TensorCores
    # get work (a 1-block grid leaves one TC idle).
    if m_pad // bm < 2 and M > 8:
        bm = _round_up((m_pad + 1) // 2, 8)
        m_pad = _round_up(M, bm)
    return bm, m_pad


def _make_actor_kernel(in_dim, hidden_dim, action_dim):
    def kernel(xin_ref, w1_ref, b1_ref, w2_ref, b2_ref, w3_ref, b3_ref,
               w4_ref, b4_ref, proj_ref, out_ref):
        xin = xin_ref[...]
        x = xin[:, :in_dim]
        araw = xin[:, in_dim:in_dim + DIM_]

        # 4-layer MLP (Linear+ReLU x3, Linear); MXU matmuls with f32 accumulate.
        h = jnp.maximum(
            jnp.dot(x, w1_ref[...], preferred_element_type=jnp.float32) + b1_ref[...], 0.0)
        h = jnp.maximum(
            jnp.dot(h, w2_ref[...], preferred_element_type=jnp.float32) + b2_ref[...], 0.0)
        h = jnp.maximum(
            jnp.dot(h, w3_ref[...], preferred_element_type=jnp.float32) + b3_ref[...], 0.0)
        aux = jnp.dot(h, w4_ref[...], preferred_element_type=jnp.float32) + b4_ref[...]

        loc = aux[:, :DIM_]
        log_scale = aux[:, DIM_:2 * DIM_]

        # entropy of Normal(loc, exp(log_scale)*0.5), mean over last dim:
        #   mean(0.5 + 0.5*log(2pi) + log_scale + log(0.5))
        ent = jnp.mean(log_scale, axis=-1, keepdims=True) + ENT_CONST

        t = jnp.tanh(araw)
        corr = jnp.sum(jnp.log(1.0 - t * t + 1e-8), axis=-1, keepdims=True)

        # z = (a - loc)/scale with 1/scale = 2*exp(-log_scale): no divide, no log(exp()).
        z = (araw - loc) * (2.0 * jnp.exp(-log_scale))
        logp = (-0.5 * jnp.sum(z * z, axis=-1, keepdims=True)
                - jnp.sum(log_scale, axis=-1, keepdims=True)
                - LOGP_CONST
                - corr)

        action = jnp.dot(t, proj_ref[...], preferred_element_type=jnp.float32)

        # direct column-slice stores into the packed output: [action | logp | ent]
        out_ref[:, :action_dim] = action
        out_ref[:, action_dim:action_dim + 1] = logp
        out_ref[:, action_dim + 1:action_dim + 2] = ent

    return kernel


def actor_forward(params, x, action_raw, block_rows=None):
    """x: (T, B, in_dim) f32; action_raw: (T, B, DIM_) f32 (train=True branch)."""
    T, B, in_dim = x.shape
    hidden_dim = params["w2"].shape[1]
    action_dim = params["proj"].shape[1]
    out_w = action_dim + 2
    M = T * B

    x2 = x.reshape(M, in_dim).astype(jnp.float32)
    a2 = action_raw.reshape(M, DIM_).astype(jnp.float32)
    # single per-row data stream: [x | action_raw]
    xin = jnp.concatenate([x2, a2], axis=1)
    in_w = in_dim + DIM_

    bm, m_pad = _choose_block_rows(M, block_rows)
    if m_pad != M:
        xin = jnp.pad(xin, ((0, m_pad - M), (0, 0)))

    kernel = _make_actor_kernel(in_dim, hidden_dim, action_dim)

    # Parameters as separate constant-index inputs: DMA'd once, laid out
    # natively (no sublane-misaligned slab slices to relayout each step).
    param_list = [params["w1"], params["b1"], params["w2"], params["b2"],
                  params["w3"], params["b3"], params["w4"], params["b4"],
                  params["proj_scaled"]]
    const_map = lambda i: (0, 0)
    param_specs = [pl.BlockSpec(p.shape, const_map) for p in param_list]

    out = pl.pallas_call(
        kernel,
        out_shape=jax.ShapeDtypeStruct((m_pad, out_w), jnp.float32),
        grid_spec=pltpu.PrefetchScalarGridSpec(
            num_scalar_prefetch=0,
            grid=(m_pad // bm,),
            in_specs=[pl.BlockSpec((bm, in_w), lambda i: (i, 0))] + param_specs,
            out_specs=pl.BlockSpec((bm, out_w), lambda i: (i, 0)),
        ),
        compiler_params=pltpu.CompilerParams(
            dimension_semantics=("parallel",),
            vmem_limit_bytes=VMEM_LIMIT_BYTES),
    )(xin, *param_list)

    action = out[:M, :action_dim].reshape(T, B, action_dim)
    logp = out[:M, action_dim].reshape(T, B)
    ent = out[:M, action_dim + 1].reshape(T, B)
    # action_raw is returned unchanged by the module in this branch.
    return action_raw, action, logp, ent


def actor_forward_ref(params, x, action_raw):
    """Pure-JAX reference for correctness checking."""
    h = jnp.maximum(x @ params["w1"] + params["b1"][0], 0.0)
    h = jnp.maximum(h @ params["w2"] + params["b2"][0], 0.0)
    h = jnp.maximum(h @ params["w3"] + params["b3"][0], 0.0)
    aux = h @ params["w4"] + params["b4"][0]
    loc, log_scale = aux[..., :DIM_], aux[..., DIM_:]
    scale = jnp.exp(log_scale) * 0.5
    ent = jnp.mean(0.5 + 0.5 * LOG_2PI + jnp.log(scale), axis=-1)
    t = jnp.tanh(action_raw)
    corr = jnp.sum(jnp.log(1.0 - t * t + 1e-8), axis=-1)
    z = (action_raw - loc) / scale
    logp = jnp.sum(-0.5 * z * z - jnp.log(scale) - 0.5 * LOG_2PI, axis=-1) - corr
    action = (t @ params["proj"]) / jnp.sqrt(jnp.float32(N_PER_COL))
    return action_raw, action, logp, ent


if __name__ == "__main__":
    T, B, in_dim, action_dim, hidden_dim = 8, 2, 12, 16, 8

    key = jax.random.PRNGKey(0)
    kp, kx, ka = jax.random.split(key, 3)
    params = init_actor_params(kp, in_dim, action_dim, hidden_dim)
    x = jax.random.normal(kx, (T, B, in_dim), jnp.float32)
    # deterministic "sample" supplied externally (action_raw is not None branch)
    action_raw = jax.random.normal(ka, (T, B, DIM_), jnp.float32)

    outs = actor_forward(params, x, action_raw)
    outs = jax.block_until_ready(outs)

    refs = actor_forward_ref(params, x, action_raw)
    for o, r in zip(outs, refs):
        np.testing.assert_allclose(np.asarray(o), np.asarray(r), rtol=1e-4, atol=1e-4)

    print("KERNEL_OK")
</pallas_src>

<mosaic_0001>
module attributes {stable_mosaic.version = 11 : i64} {
  func.func @kernel(%arg0: i32, %arg1: memref<8x27xf32, #tpu.memory_space<vmem>>, %arg2: memref<12x15xf32, #tpu.memory_space<vmem>>, %arg3: memref<1x15xf32, #tpu.memory_space<vmem>>, %arg4: memref<15x8xf32, #tpu.memory_space<vmem>>, %arg5: memref<1x8xf32, #tpu.memory_space<vmem>>, %arg6: memref<8x15xf32, #tpu.memory_space<vmem>>, %arg7: memref<1x15xf32, #tpu.memory_space<vmem>>, %arg8: memref<15x30xf32, #tpu.memory_space<vmem>>, %arg9: memref<1x30xf32, #tpu.memory_space<vmem>>, %arg10: memref<15x16xf32, #tpu.memory_space<vmem>>, %arg11: memref<8x18xf32, #tpu.memory_space<vmem>>) attributes {dimension_semantics = [#tpu.dimension_semantics<parallel>], iteration_bounds = array<i64: 2>, scalar_prefetch = 0 : i64, scratch_operands = 0 : i64, tpu.core_type = #tpu.core_type<tc>, window_params = [{transform_indices = @transform_0, window_bounds = array<i64: 8, 27>}, {pipeline_mode = #tpu.pipeline_mode<synchronous>, transform_indices = @transform_1, window_bounds = array<i64: 12, 15>}, {pipeline_mode = #tpu.pipeline_mode<synchronous>, transform_indices = @transform_2, window_bounds = array<i64: 1, 15>}, {pipeline_mode = #tpu.pipeline_mode<synchronous>, transform_indices = @transform_3, window_bounds = array<i64: 15, 8>}, {pipeline_mode = #tpu.pipeline_mode<synchronous>, transform_indices = @transform_4, window_bounds = array<i64: 1, 8>}, {pipeline_mode = #tpu.pipeline_mode<synchronous>, transform_indices = @transform_5, window_bounds = array<i64: 8, 15>}, {pipeline_mode = #tpu.pipeline_mode<synchronous>, transform_indices = @transform_6, window_bounds = array<i64: 1, 15>}, {pipeline_mode = #tpu.pipeline_mode<synchronous>, transform_indices = @transform_7, window_bounds = array<i64: 15, 30>}, {pipeline_mode = #tpu.pipeline_mode<synchronous>, transform_indices = @transform_8, window_bounds = array<i64: 1, 30>}, {pipeline_mode = #tpu.pipeline_mode<synchronous>, transform_indices = @transform_9, window_bounds = array<i64: 15, 16>}, {transform_indices = @transform_10, window_bounds = array<i64: 8, 18>}]} {
    %c0 = arith.constant 0 : index
    %c0_0 = arith.constant 0 : index
    %0 = vector.load %arg1[%c0, %c0_0] : memref<8x27xf32, #tpu.memory_space<vmem>>, vector<8x27xf32>
    %1 = vector.extract_strided_slice %0 {offsets = [0, 0], sizes = [8, 12], strides = [1, 1]} : vector<8x27xf32> to vector<8x12xf32>
    %2 = vector.extract_strided_slice %0 {offsets = [0, 12], sizes = [8, 15], strides = [1, 1]} : vector<8x27xf32> to vector<8x15xf32>
    %c0_1 = arith.constant 0 : index
    %c0_2 = arith.constant 0 : index
    %3 = vector.load %arg2[%c0_1, %c0_2] : memref<12x15xf32, #tpu.memory_space<vmem>>, vector<12x15xf32>
    %cst = arith.constant dense<0.000000e+00> : vector<8x15xf32>
    %4 = tpu.matmul %1, %3, %cst {dimension_numbers = #tpu.dot_dimension_numbers<[1], [0], [0], [1], [0, 0, 1, 1], [], []>} : vector<8x12xf32>, vector<12x15xf32>, vector<8x15xf32> -> vector<8x15xf32>
    %c0_3 = arith.constant 0 : index
    %c0_4 = arith.constant 0 : index
    %5 = vector.load %arg3[%c0_3, %c0_4] : memref<1x15xf32, #tpu.memory_space<vmem>>, vector<1x15xf32>
    %6 = vector.broadcast %5 : vector<1x15xf32> to vector<8x15xf32>
    %7 = arith.addf %4, %6 : vector<8x15xf32>
    %cst_5 = arith.constant 0.000000e+00 : f32
    %8 = vector.broadcast %cst_5 : f32 to vector<8x15xf32>
    %9 = arith.maximumf %7, %8 : vector<8x15xf32>
    %c0_6 = arith.constant 0 : index
    %c0_7 = arith.constant 0 : index
    %10 = vector.load %arg4[%c0_6, %c0_7] : memref<15x8xf32, #tpu.memory_space<vmem>>, vector<15x8xf32>
    %cst_8 = arith.constant dense<0.000000e+00> : vector<8x8xf32>
    %11 = tpu.matmul %9, %10, %cst_8 {dimension_numbers = #tpu.dot_dimension_numbers<[1], [0], [0], [1], [0, 0, 1, 1], [], []>} : vector<8x15xf32>, vector<15x8xf32>, vector<8x8xf32> -> vector<8x8xf32>
    %c0_9 = arith.constant 0 : index
    %c0_10 = arith.constant 0 : index
    %12 = vector.load %arg5[%c0_9, %c0_10] : memref<1x8xf32, #tpu.memory_space<vmem>>, vector<1x8xf32>
    %13 = vector.broadcast %12 : vector<1x8xf32> to vector<8x8xf32>
    %14 = arith.addf %11, %13 : vector<8x8xf32>
    %cst_11 = arith.constant 0.000000e+00 : f32
    %15 = vector.broadcast %cst_11 : f32 to vector<8x8xf32>
    %16 = arith.maximumf %14, %15 : vector<8x8xf32>
    %c0_12 = arith.constant 0 : index
    %c0_13 = arith.constant 0 : index
    %17 = vector.load %arg6[%c0_12, %c0_13] : memref<8x15xf32, #tpu.memory_space<vmem>>, vector<8x15xf32>
    %cst_14 = arith.constant dense<0.000000e+00> : vector<8x15xf32>
    %18 = tpu.matmul %16, %17, %cst_14 {dimension_numbers = #tpu.dot_dimension_numbers<[1], [0], [0], [1], [0, 0, 1, 1], [], []>} : vector<8x8xf32>, vector<8x15xf32>, vector<8x15xf32> -> vector<8x15xf32>
    %c0_15 = arith.constant 0 : index
    %c0_16 = arith.constant 0 : index
    %19 = vector.load %arg7[%c0_15, %c0_16] : memref<1x15xf32, #tpu.memory_space<vmem>>, vector<1x15xf32>
    %20 = vector.broadcast %19 : vector<1x15xf32> to vector<8x15xf32>
    %21 = arith.addf %18, %20 : vector<8x15xf32>
    %cst_17 = arith.constant 0.000000e+00 : f32
    %22 = vector.broadcast %cst_17 : f32 to vector<8x15xf32>
    %23 = arith.maximumf %21, %22 : vector<8x15xf32>
    %c0_18 = arith.constant 0 : index
    %c0_19 = arith.constant 0 : index
    %24 = vector.load %arg8[%c0_18, %c0_19] : memref<15x30xf32, #tpu.memory_space<vmem>>, vector<15x30xf32>
    %cst_20 = arith.constant dense<0.000000e+00> : vector<8x30xf32>
    %25 = tpu.matmul %23, %24, %cst_20 {dimension_numbers = #tpu.dot_dimension_numbers<[1], [0], [0], [1], [0, 0, 1, 1], [], []>} : vector<8x15xf32>, vector<15x30xf32>, vector<8x30xf32> -> vector<8x30xf32>
    %c0_21 = arith.constant 0 : index
    %c0_22 = arith.constant 0 : index
    %26 = vector.load %arg9[%c0_21, %c0_22] : memref<1x30xf32, #tpu.memory_space<vmem>>, vector<1x30xf32>
    %27 = vector.broadcast %26 : vector<1x30xf32> to vector<8x30xf32>
    %28 = arith.addf %25, %27 : vector<8x30xf32>
    %29 = vector.extract_strided_slice %28 {offsets = [0, 0], sizes = [8, 15], strides = [1, 1]} : vector<8x30xf32> to vector<8x15xf32>
    %30 = vector.extract_strided_slice %28 {offsets = [0, 15], sizes = [8, 15], strides = [1, 1]} : vector<8x30xf32> to vector<8x15xf32>
    %cst_23 = arith.constant dense<0.000000e+00> : vector<8xf32>
    %31 = vector.multi_reduction <add>, %30, %cst_23 [1] : vector<8x15xf32> to vector<8xf32>
    %32 = vector.shape_cast %31 : vector<8xf32> to vector<8x1xf32>
    %cst_24 = arith.constant 1.500000e+01 : f32
    %33 = vector.broadcast %cst_24 : f32 to vector<8x1xf32>
    %34 = arith.divf %32, %33 : vector<8x1xf32>
    %cst_25 = arith.constant 0.725791335 : f32
    %35 = vector.broadcast %cst_25 : f32 to vector<8x1xf32>
    %36 = arith.addf %34, %35 : vector<8x1xf32>
    %37 = math.tanh %2 : vector<8x15xf32>
    %38 = arith.mulf %37, %37 : vector<8x15xf32>
    %cst_26 = arith.constant 1.000000e+00 : f32
    %39 = vector.broadcast %cst_26 : f32 to vector<8x15xf32>
    %40 = arith.subf %39, %38 : vector<8x15xf32>
    %cst_27 = arith.constant 9.99999993E-9 : f32
    %41 = vector.broadcast %cst_27 : f32 to vector<8x15xf32>
    %42 = arith.addf %40, %41 : vector<8x15xf32>
    %43 = math.log %42 : vector<8x15xf32>
    %cst_28 = arith.constant dense<0.000000e+00> : vector<8xf32>
    %44 = vector.multi_reduction <add>, %43, %cst_28 [1] : vector<8x15xf32> to vector<8xf32>
    %45 = vector.shape_cast %44 : vector<8xf32> to vector<8x1xf32>
    %46 = arith.subf %2, %29 : vector<8x15xf32>
    %cst_29 = arith.constant 0.000000e+00 : f32
    %47 = vector.broadcast %cst_29 : f32 to vector<8x15xf32>
    %48 = arith.subf %47, %30 : vector<8x15xf32>
    %49 = math.exp %48 : vector<8x15xf32>
    %cst_30 = arith.constant 2.000000e+00 : f32
    %50 = vector.broadcast %cst_30 : f32 to vector<8x15xf32>
    %51 = arith.mulf %50, %49 : vector<8x15xf32>
    %52 = arith.mulf %46, %51 : vector<8x15xf32>
    %53 = arith.mulf %52, %52 : vector<8x15xf32>
    %cst_31 = arith.constant dense<0.000000e+00> : vector<8xf32>
    %54 = vector.multi_reduction <add>, %53, %cst_31 [1] : vector<8x15xf32> to vector<8xf32>
    %55 = vector.shape_cast %54 : vector<8xf32> to vector<8x1xf32>
    %cst_32 = arith.constant -5.000000e-01 : f32
    %56 = vector.broadcast %cst_32 : f32 to vector<8x1xf32>
    %57 = arith.mulf %56, %55 : vector<8x1xf32>
    %cst_33 = arith.constant dense<0.000000e+00> : vector<8xf32>
    %58 = vector.multi_reduction <add>, %30, %cst_33 [1] : vector<8x15xf32> to vector<8xf32>
    %59 = vector.shape_cast %58 : vector<8xf32> to vector<8x1xf32>
    %60 = arith.subf %57, %59 : vector<8x1xf32>
    %cst_34 = arith.constant 3.38687038 : f32
    %61 = vector.broadcast %cst_34 : f32 to vector<8x1xf32>
    %62 = arith.subf %60, %61 : vector<8x1xf32>
    %63 = arith.subf %62, %45 : vector<8x1xf32>
    %c0_35 = arith.constant 0 : index
    %c0_36 = arith.constant 0 : index
    %64 = vector.load %arg10[%c0_35, %c0_36] : memref<15x16xf32, #tpu.memory_space<vmem>>, vector<15x16xf32>
    %cst_37 = arith.constant dense<0.000000e+00> : vector<8x16xf32>
    %65 = tpu.matmul %37, %64, %cst_37 {dimension_numbers = #tpu.dot_dimension_numbers<[1], [0], [0], [1], [0, 0, 1, 1], [], []>} : vector<8x15xf32>, vector<15x16xf32>, vector<8x16xf32> -> vector<8x16xf32>
    %c0_38 = arith.constant 0 : index
    %c0_39 = arith.constant 0 : index
    %66 = vector.load %arg11[%c0_38, %c0_39] : memref<8x18xf32, #tpu.memory_space<vmem>>, vector<8x16xf32>
    tpu.vector_store %arg11[%c0_38, %c0_39], %65 {strides = array<i32>} : memref<8x18xf32, #tpu.memory_space<vmem>>, vector<8x16xf32>,
    %c0_40 = arith.constant 0 : index
    %c16 = arith.constant 16 : index
    %67 = vector.load %arg11[%c0_40, %c16] : memref<8x18xf32, #tpu.memory_space<vmem>>, vector<8x1xf32>
    tpu.vector_store %arg11[%c0_40, %c16], %63 {strides = array<i32>} : memref<8x18xf32, #tpu.memory_space<vmem>>, vector<8x1xf32>,
    %c0_41 = arith.constant 0 : index
    %c17 = arith.constant 17 : index
    %68 = vector.load %arg11[%c0_41, %c17] : memref<8x18xf32, #tpu.memory_space<vmem>>, vector<8x1xf32>
    tpu.vector_store %arg11[%c0_41, %c17], %36 {strides = array<i32>} : memref<8x18xf32, #tpu.memory_space<vmem>>, vector<8x1xf32>,
    return
  }
  func.func @transform_0(%arg0: i32) -> (i32, i32) {
    %c0_i32 = arith.constant 0 : i32
    %c0_i32_0 = arith.constant 0 : i32
    return %arg0, %c0_i32 : i32, i32
  }
  func.func @transform_1(%arg0: i32) -> (i32, i32) {
    %c0_i32 = arith.constant 0 : i32
    %c0_i32_0 = arith.constant 0 : i32
    %c0_i32_1 = arith.constant 0 : i32
    return %c0_i32, %c0_i32_0 : i32, i32
  }
  func.func @transform_2(%arg0: i32) -> (i32, i32) {
    %c0_i32 = arith.constant 0 : i32
    %c0_i32_0 = arith.constant 0 : i32
    %c0_i32_1 = arith.constant 0 : i32
    return %c0_i32, %c0_i32_0 : i32, i32
  }
  func.func @transform_3(%arg0: i32) -> (i32, i32) {
    %c0_i32 = arith.constant 0 : i32
    %c0_i32_0 = arith.constant 0 : i32
    %c0_i32_1 = arith.constant 0 : i32
    return %c0_i32, %c0_i32_0 : i32, i32
  }
  func.func @transform_4(%arg0: i32) -> (i32, i32) {
    %c0_i32 = arith.constant 0 : i32
    %c0_i32_0 = arith.constant 0 : i32
    %c0_i32_1 = arith.constant 0 : i32
    return %c0_i32, %c0_i32_0 : i32, i32
  }
  func.func @transform_5(%arg0: i32) -> (i32, i32) {
    %c0_i32 = arith.constant 0 : i32
    %c0_i32_0 = arith.constant 0 : i32
    %c0_i32_1 = arith.constant 0 : i32
    return %c0_i32, %c0_i32_0 : i32, i32
  }
  func.func @transform_6(%arg0: i32) -> (i32, i32) {
    %c0_i32 = arith.constant 0 : i32
    %c0_i32_0 = arith.constant 0 : i32
    %c0_i32_1 = arith.constant 0 : i32
    return %c0_i32, %c0_i32_0 : i32, i32
  }
  func.func @transform_7(%arg0: i32) -> (i32, i32) {
    %c0_i32 = arith.constant 0 : i32
    %c0_i32_0 = arith.constant 0 : i32
    %c0_i32_1 = arith.constant 0 : i32
    return %c0_i32, %c0_i32_0 : i32, i32
  }
  func.func @transform_8(%arg0: i32) -> (i32, i32) {
    %c0_i32 = arith.constant 0 : i32
    %c0_i32_0 = arith.constant 0 : i32
    %c0_i32_1 = arith.constant 0 : i32
    return %c0_i32, %c0_i32_0 : i32, i32
  }
  func.func @transform_9(%arg0: i32) -> (i32, i32) {
    %c0_i32 = arith.constant 0 : i32
    %c0_i32_0 = arith.constant 0 : i32
    %c0_i32_1 = arith.constant 0 : i32
    return %c0_i32, %c0_i32_0 : i32, i32
  }
  func.func @transform_10(%arg0: i32) -> (i32, i32) {
    %c0_i32 = arith.constant 0 : i32
    %c0_i32_0 = arith.constant 0 : i32
    return %arg0, %c0_i32 : i32, i32
  }
}

</mosaic_0001>

<bundles_post_ra>
// kernel: tpu_custom_call.1
= control target key start
LH: loop header
LB: loop body
LE: loop exit
PB: predicated region body
PF: predicated region fallthrough
CT: control target
= control target key end

     0   :  { %s1635_s0 = inlined_call_operand.vmem [shape: f32[16,27], index: 0, kind: input, shape index: {}]   ;;  %s1636_s1 = inlined_call_operand.hbm [shape: f32[12,15], index: 1, kind: input, shape index: {}]   ;;  %s1637_s2 = inlined_call_operand.vmem [shape: f32[1,15], index: 2, kind: input, shape index: {}]   ;;  %s1638_s3 = inlined_call_operand.vmem [shape: f32[15,8], index: 3, kind: input, shape index: {}]   ;;  %s1639_s4 = inlined_call_operand.vmem [shape: f32[1,8], index: 4, kind: input, shape index: {}]   ;;  %s1640_s5 = inlined_call_operand.hbm [shape: f32[8,15], index: 5, kind: input, shape index: {}]   ;;  %s1641_s6 = inlined_call_operand.hbm [shape: f32[1,15], index: 6, kind: input, shape index: {}]   ;;  %s1642_s7 = inlined_call_operand.vmem [shape: f32[15,30], index: 7, kind: input, shape index: {}]   ;;  %s1643_s8 = inlined_call_operand.vmem [shape: f32[1,30], index: 8, kind: input, shape index: {}]   ;;  %s1644_s9 = inlined_call_operand.vmem [shape: f32[15,16], index: 9, kind: input, shape index: {}]   ;;  %s1645_s10 = inlined_call_operand.hbm [shape: f32[16,18], index: 10, kind: output, shape index: {}]  }
   0x1   :  { %1653 = sst [smem:[#allocation16_spill]] %s1640_s5 }
   0x2   :  { %15 = vsyncpa [#allocation3], 0 }
   0x3   :  { %16 = vsyncpa [#allocation6], 0 }
   0x4   :  { %17 = vsyncpa [#allocation4], 0 }
   0x5   :  { %19 = vsyncpa [#allocation4 + $0x1], 0  ;;  %s1382_s13 = smov 0   ;;  %s1384_s14 = smov 0  }
   0x6   :  { %s1386_s15 = smov 0   ;;  %s1388_s16 = smov 0  }
   0x7 LB: > { %1654 = sst [smem:[#allocation12_spill]] %s1307_s15  ;;  %s1403_s17 = sadd.s32 4294967295, %s1311_s16   ;;  %s1311_s16 = sphi %s1388_s16, %s1674_s16   ;;  %s1307_s15 = sphi %s1386_s15, %s1676_s15   ;;  %s1303_s14 = sphi %s1384_s14, %s1678_s14   ;;  %s1299_s13 = sphi %s1382_s13, %s1677_s13  }
   0x8   : > { %s978_s18 = sadd.s32 4294967294, %s1311_s16   ;;  %s1407_s19 = sadd.s32 1, %s1311_s16  }
   0x9   : > { %1655 = sst [smem:[#allocation13_spill]] %s1407_s19  ;;  %s247_s20 = sadd.s32 1, %s1307_s15 }
   0xa   : > { %s244_s21 = ssub.s32 %s1311_s16, %s1407_s19  ;;  %p257_p0 = scmp.ne.s32.totalorder %s1307_s15, %s1303_s14 }
   0xb   : > { %p245_p1 = scmp.eq.s32.totalorder %s244_s21, 0  ;;  %p258_p2 = scmp.eq.s32.totalorder %s1403_s17, 1 }
   0xc   : > { %p263_p3 = scmp.ne.s32.totalorder %s1303_s14, %s1299_s13  ;;  %p264_p4 = scmp.eq.s32.totalorder %s978_s18, 1 }
   0xd   : > { %s1418_s22 = scalar_select %p245_p1, %s1307_s15, %s247_s20  }
   0xe   : > { %p1420_p5 = por %p258_p2, %p257_p0  ;;  %p1424_p6 = por %p264_p4, %p263_p3 }
   0xf   : > { %1656 = sst [smem:[#allocation14_spill]] %s1418_s22  ;;  %p979_p7 = scmp.ge.s32.totalorder %s1311_s16, 1 }
  0x10   : > { %s1657_s23 = scalar_select %p1420_p5, 1, 0 }
  0x11   : > { %s1658_s24 = scalar_select %p1424_p6, 1, 0 }
  0x12   : > { %p271_p8 = scmp.lt.s32.totalorder %s1311_s16, 3  ;;  %p1647_p9 = scmp.eq.s32.totalorder %s1403_s17, 0 }
  0x13   : > { %1659 = sst [smem:[#allocation15_spill]] %s1658_s24  ;;  %s1313_s26 = smov [#allocation5]  }
  0x14   : > { %p1431_p10 = pnand %p979_p7, %p271_p8  ;;  %s306_s27 = sshll.u32 %s1313_s26, 4  ;;  %s307_s27 = int_to_ptr.vmem [resolvable:$true] %s306_s27 }
  0x15   : > { %s1314_s28 = smov [#allocation2]   ;;  %s1315_s11 = smov [#allocation7]  }
  0x16   : > { %s1660_s25 = scalar_select %p1431_p10, 1, 0 }
  0x17   : > { %p1085_p11 = pneg %p1431_p10  ;;  %s283_s29 = sshll.u32 %s1314_s28, 4  ;;  %s1443_s29 = int_to_ptr.vmem [resolvable:$true] %s283_s29 }
  0x18   : > { %s1445_s12 = sshll.u32 %s1315_s11, 4  ;;  %s1662_s5 = sld [smem:[#allocation16_spill]]  ;;  %s318_s12 = int_to_ptr.vmem [resolvable:$true] %s1445_s12 }
  0x19   : > { %p1439_p12 = pnand %p1647_p9, %p1085_p11 }
  0x1b   : > { %p1455_p0 = pneg %p1439_p12 }
  0x1e   : > { %s1157_s21 = scalar_lea.hbm %s1662_s5, 128 }
  0x1f   : > { %p1158_p13 = scmp.ne.s32.totalorder %s1662_s5, %s1157_s21  ;;  %p1164_p3 = scmp.lt.u32.totalorder %s1157_s21, %s1662_s5 }
  0x21   : > { %p1160_p1 = pnand %p1455_p0, %p1158_p13 }
  0x23   : > { %p1161_p2 = pneg %p1160_p1 }
  0x25   : > { %p1166_p4 = pnand %p1164_p3, %p1161_p2 }
  0x27   : > { %1169 = shalt.err (!%p1166_p4)
}
  0x28   : > { %s1170_s18 = scalar_lea.vmem %s307_s27, 128  ;;  %p1178_p9 = scmp.lt.s32.totalorder %s307_s27, %s307_s27 }
  0x29   : > { %p1171_p7 = scmp.ne.s32.totalorder %s307_s27, %s1170_s18  ;;  %p1179_p6 = scmp.lt.s32.totalorder %s1170_s18, %s1170_s18 }
  0x2b   : > { %p1173_p8 = pnand %p1171_p7, %p1455_p0  ;;  %p1180_p5 = por %p1179_p6, %p1178_p9 }
  0x2d   : > { %p1174_p11 = pneg %p1173_p8 }
  0x2f   : > { %p1181_p10 = pnand %p1180_p5, %p1174_p11 }
  0x31   : > { %1184 = shalt.err (!%p1181_p10)
}
  0x32   : > { %1091 = dma.hbm_to_vmem [thread:$0]  (!%p1439_p12), %s1662_s5, 128, %s307_s27, [#allocation6]  }
  0x33   : > { %s1185_s26 = scalar_lea.hbm %s1636_s1, 256 }
  0x34   : > { %p1186_p13 = scmp.ne.s32.totalorder %s1636_s1, %s1185_s26  ;;  %p1192_p5 = scmp.lt.u32.totalorder %s1185_s26, %s1636_s1 }
  0x36   : > { %p1188_p1 = pnand %p1186_p13, %p1455_p0 }
  0x38   : > { %p1189_p6 = pneg %p1188_p1 }
  0x3a   : > { %p1194_p9 = pnand %p1192_p5, %p1189_p6 }
  0x3c   : > { %1197 = shalt.err (!%p1194_p9)
}
  0x3d   : > { %s1198_s27 = scalar_lea.vmem %s1443_s29, 256  ;;  %p1206_p4 = scmp.lt.s32.totalorder %s1443_s29, %s1443_s29 }
  0x3e   : > { %p1199_p10 = scmp.ne.s32.totalorder %s1443_s29, %s1198_s27  ;;  %p1207_p7 = scmp.lt.s32.totalorder %s1198_s27, %s1198_s27 }
  0x40   : > { %p1201_p2 = pnand %p1199_p10, %p1455_p0  ;;  %p1208_p8 = por %p1207_p7, %p1206_p4 }
  0x42   : > { %p1202_p3 = pneg %p1201_p2 }
  0x44   : > { %p1209_p11 = pnand %p1208_p8, %p1202_p3 }
  0x46   : > { %1212 = shalt.err (!%p1209_p11)
}
  0x47   : > { %s1316_s19 = smov 128   ;;  %s1317_s24 = smov 8  }
  0x48   : > { %1088 = dma.hbm_to_vmem [thread:$0]  (!%p1439_p12), %s1636_s1, 256, %s1443_s29, [#allocation3], %s1316_s19, %s1316_s19, %s1317_s24  }
  0x49   : > { %s1213_s26 = scalar_lea.hbm %s1641_s6, 16 }
  0x4a   : > { %p1214_p13 = scmp.ne.s32.totalorder %s1641_s6, %s1213_s26  ;;  %p1220_p5 = scmp.lt.u32.totalorder %s1213_s26, %s1641_s6 }
  0x4c   : > { %p1216_p1 = pnand %p1214_p13, %p1455_p0 }
  0x4e   : > { %p1217_p6 = pneg %p1216_p1 }
  0x50   : > { %p1222_p9 = pnand %p1220_p5, %p1217_p6 }
  0x52   : > { %1225 = shalt.err (!%p1222_p9)
}
  0x53   : > { %s1226_s22 = scalar_lea.vmem %s318_s12, 16  ;;  %s1233_s29 = scalar_lea.vmem %s318_s12, 32 }
  0x54   : > { %p1227_p10 = scmp.ne.s32.totalorder %s318_s12, %s1226_s22  ;;  %p1234_p4 = scmp.lt.s32.totalorder %s318_s12, %s318_s12 }
  0x55   : > { %p1235_p7 = scmp.lt.s32.totalorder %s1233_s29, %s1226_s22 }
  0x56   : > { %p1229_p2 = pnand %p1227_p10, %p1455_p0 }
  0x57   : > { %p1236_p8 = por %p1235_p7, %p1234_p4 }
  0x58   : > { %p1230_p3 = pneg %p1229_p2 }
  0x5a   : > { %p1237_p11 = pnand %p1236_p8, %p1230_p3 }
  0x5c   : > { %1240 = shalt.err (!%p1237_p11)
}
  0x5d   : > { %1094 = dma.hbm_to_vmem [thread:$0]  (!%p1439_p12), %s1641_s6, 16, %s318_s12, [#allocation6]  }
  0x5e   : > { %p1664_p13 = scmp.ne.s32.totalorder %s1660_s25, 0 }
  0x5f   : > { %p1665_p1 = scmp.eq.s32.totalorder (!%p1664_p13), %s1403_s17, 0 }
  0x60   : > { %346 = sbr.rel (%p1664_p13) target bundleno = 1394 (0x572), region = 60 }
  0x67   : > { %1286 = dma.done.wait (%p1665_p1), [#allocation3], 256   ;;  %p1666_p0 = pmov %p1665_p1 }
  0x69   : > { %1288 = vsyncadd (%p1666_p0), [#allocation3], 4294967040  ;;  %p1667_p6 = pmov %p1666_p0 }
  0x6a   : > { %p1668_p5 = pmov %p1666_p0 }
  0x6b   : > { %1290 = dma.done.wait (%p1667_p6), [#allocation6], 144  }
  0x6c   : > { %1292 = vsyncadd (%p1668_p5), [#allocation6], 4294967152  ;;  %v1318_v0 = vmov 0.0|0.0   ;;  %p391_p12 = scmp.lt.s32.totalorder %s1403_s17, 1  ;;  %vm1319_vm0 = vmmov 0   ;;  %v1320_v1 = vmov 0.0  }
  0x6d   : > { %1055 = vmatprep.subr.bf16.mxu0 %v1318_v0  ;;  %1059 = vmatprep.subr.bf16.mxu1 %v1318_v0  ;;  %vm409_vm1 = vcmask 1043456   ;;  %v396_v2 = vld [vmem:[#allocation2] sm:$0xff]  ;;  %v397_v3 = vld [vmem:[#allocation2 + $0x8] sm:$0xf]  ;;  %vm1321_vm2 = vmmov 1   ;;  %vm405_vm4 = vcmask 97280  }
  0x6e   : > { %1026 = vmatprep.mubr.msk.f32.mxu0 %vm1319_vm0, %v1320_v1  ;;  %1033 = vmatprep.mubr.msk.f32.mxu1 %vm1319_vm0, %v1320_v1  ;;  %s392_s5 = scalar_select %p391_p12, %s1403_s17, 1  ;;  %vm1057_vm3 = vmpackc.low %vm409_vm1, %vm1321_vm2  ;;  %v1056_v4 = vpack.c.bf16 %v397_v3, %v396_v2  ;;  %v484_v6 = vld [vmem:[%s1638_s3] sm:$0xff]  ;;  %v485_v7 = vld [vmem:[%s1638_s3 + $0x8] sm:$0x7f]  ;;  %vm497_vm5 = vcmask 1046528   ;;  %vm493_vm7 = vcmask 121856  }
  0x6f   : > { %v1060_v8 = vpack.c.bf16 %v485_v7, %v484_v6  ;;  %vm1540_vm6 = vmpackc.low %vm497_vm5, %vm1321_vm2  ;;  %v990_v10 = vld [vmem:[%s1637_s2] ss:$0 sm:$0xff]  ;;  %v572_v15 = vld [vmem:[#allocation5] sm:$0xff]  ;;  %vm580_vm8 = vcmask 64512   ;;  %s1323_s26 = smov 12   ;;  %s1324_s11 = smov 113  }
  0x70   : > { %s989_s25 = sshll.u32 %s392_s5, 3  ;;  %1058 = vmatpush3.bf16.msk.msra.mxu0 %vm1057_vm3, %v1056_v4  ;;  %v993_v16 = vld [vmem:[%s1639_s4] ss:$0 sm:$0xff]  ;;  %v656_v22 = vld [vmem:[%s1642_s7 + $0x8] sm:$0x7f]  ;;  %s1325_s18 = smov 125  }
  0x71   : > { %s394_s28 = scalar_lea.vmem %s1635_s0, %s989_s25  ;;  %1036 = vmatprep.subr.mxu0 %v1320_v1  ;;  %1062 = vmatpush3.bf16.msk.msra.mxu1 %vm1540_vm6, %v1060_v8  ;;  %v655_v21 = vld [vmem:[%s1642_s7] sm:$0xff]  ;;  %s1322_s25 = smov 116   ;;  %v996_v25 = vld [vmem:[#allocation7] ss:$0 sm:$0xff]  ;;  %v789_v31 = vld [vmem:[%s1644_s9 + $0x8] sm:$0x7f] }
  0x72   : > { %v1530_v5 = vld [vmem:[%s394_s28] sm:$0xff]  ;;  %1063 = vmatprep.subr.bf16.mxu1 %v1318_v0  ;;  %v1064_v23 = vpack.c.bf16 %v656_v22, %v655_v21  ;;  %s388_s27 = sand.u32 1, %s1303_s14   ;;  %vm868_vm9 = vcmask 130048   ;;  %s1005_s19 = sshll.u32 %s1403_s17, 7  ;;  %vm870_vm10 = vcmask 138368   ;;  %vm872_vm11 = vcmask 146568  }
  0x73   : > { %1027 = vmatmul.mubr.msk.f32.vlgmr.msra.gmra.mrb[0].mxu0 %vm405_vm4, %v1530_v5  ;;  %1151 = vtanh.f32 %v1530_v5  ;;  %v788_v30 = vld [vmem:[%s1644_s9] sm:$0xff]  ;;  %s988_s22 = sshll.u32 %s388_s27, 3  ;;  %s1591_s30 = scalar_lea.hbm %s1645_s10, %s1005_s19 }
  0x74   : > { %1038 = vmatprep.mubr.msk.f32.mxu0 %vm1319_vm0, %v1320_v1  ;;  %1037 = vmatpush3.msra.mxu0 %v572_v15  ;;  %v1068_v32 = vpack.c.bf16 %v789_v31, %v788_v30  ;;  %v998_v33 = vld [vmem:[%s1643_s8] ss:$0 sm:$0xff]  ;;  %s390_s29 = scalar_lea.vmem [#allocation8], %s988_s22  ;;  %s875_s12 = scalar_lea.sflag [#allocation4], %s388_s27 }
  0x75   : > { %1067 = vmatprep.subr.bf16.mxu0 %v1318_v0  ;;  %s888_s24 = sshll.u32 %s390_s29, 4  ;;  %p1671_p10 = scmp.ne.s32.totalorder %s1657_s23, 0  ;;  %s1593_s24 = int_to_ptr.vmem [resolvable:$true] %s888_s24 }
  0x76   : > { %s1241_s17 = scalar_lea.vmem %s1593_s24, 128  ;;  %s1326_s28 = smov [#allocation8]  }
  0x77   : > { %p1242_p9 = scmp.ne.s32.totalorder %s1593_s24, %s1241_s17  ;;  %s1245_s20 = sshll.u32 %s1326_s28, 4  ;;  %s1246_s20 = int_to_ptr.vmem [resolvable:$false] %s1245_s20 }
  0x78   : > { %s1247_s15 = scalar_lea.vmem %s1246_s20, 256  ;;  %p1248_p4 = scmp.lt.s32.totalorder %s1593_s24, %s1246_s20 }
  0x79   : > { %p1243_p2 = pnand %p1242_p9, %p1671_p10  ;;  %p1249_p7 = scmp.lt.s32.totalorder %s1247_s15, %s1241_s17 }
  0x7b   : > { %p1244_p3 = pneg %p1243_p2  ;;  %p1250_p8 = por %p1249_p7, %p1248_p4 }
  0x7d   : > { %v1152_v24 = vpop.eup %1151  ;;  %p1251_p11 = pnand %p1250_p8, %p1244_p3 }
  0x7e   : > { %791 = vrot.lane.b32.xlu0 %v1152_v24, %s1322_s25  ;;  %v751_v42 = vmul.f32 %v1152_v24, %v1152_v24 }
  0x80   : > { %v752_v43 = vsub.f32 1.0, %v751_v42 }
  0x82   : > { %v753_v44 = vadd.f32 1e-08, %v752_v43 }
  0xf0   : > { %v792_v34 = vpop.permute.xlu0 %791 }
 0x146   : > { %v479_v11 = vpop.f32.mrb[0].mxu0 }
 0x147   : > { %v480_v12 = vadd.f32 %v990_v10, %v479_v11  ;;  %v1028_v13 = vpop.f32.mrb[1].mxu0 }
 0x149   : > { %v483_v14 = vmax.f32 %v480_v12, 0.0 }
 0x14b   : > { %1034 = vmatmul.mubr.msk.f32.vlgmr.msra.gmra.mrb[0].mxu1 %vm493_vm7, %v483_v14 }
 0x14c   : > { %1045 = vmatprep.mubr.msk.f32.mxu1 %vm1319_vm0, %v1320_v1  ;;  %1066 = vmatpush3.bf16.msk.msra.mxu1 %vm1540_vm6, %v1064_v23 }
 0x21e   : > { %v567_v17 = vpop.f32.mrb[0].mxu1 }
 0x21f   : > { %v568_v18 = vadd.f32 %v993_v16, %v567_v17  ;;  %v1035_v19 = vpop.f32.mrb[1].mxu1 }
 0x221   : > { %v571_v20 = vmax.f32 %v568_v18, 0.0 }
 0x223   : > { %1039 = vmatmul.mubr.msk.f32.vlgmr.msra.gmra.mrb[2].mxu0 %vm580_vm8, %v571_v20 }
 0x224   : > { %1052 = vmatprep.mubr.msk.f32.mxu0 %vm1319_vm0, %v1320_v1  ;;  %1070 = vmatpush3.bf16.msk.msra.mxu0 %vm1540_vm6, %v1068_v32 }
 0x227   : > { %1053 = vmatmul.mubr.msk.f32.vlgmr.msra.gmra.mrb[4].mxu0 %vm493_vm7, %v792_v34 }
 0x2f6   : > { %v650_v26 = vpop.f32.mrb[2].mxu0 }
 0x2f7   : > { %v651_v27 = vadd.f32 %v996_v25, %v650_v26  ;;  %v1040_v28 = vpop.f32.mrb[3].mxu0 }
 0x2f9   : > { %v654_v29 = vmax.f32 %v651_v27, 0.0 }
 0x2fa   : > { %v864_v54 = vpop.f32.mrb[4].mxu0 }
 0x2fb   : > { %1046 = vmatmul.mubr.msk.f32.vlgmr.msra.gmra.mrb[2].mxu1 %vm493_vm7, %v654_v29  ;;  %869 = vst.msk [vmem:[%s390_s29] sm:$0xff] %vm868_vm9, %v864_v54  ;;  %v1054_v55 = vpop.f32.mrb[5].mxu0 }
 0x3ce   : > { %v736_v35 = vpop.f32.mrb[2].mxu1 }
 0x3cf   : > { %v737_v36 = vadd.f32 %v998_v33, %v736_v35  ;;  %v1047_v37 = vpop.f32.mrb[3].mxu1 }
 0x3d1   : > { %v767_v38 = vsub.f32 0.0, %v737_v36  ;;  %763 = vrot.lane.b32.xlu0 %v737_v36, %s1323_s26 }
 0x3d3   : > { %v768_v39 = vmul.f32 1.442695, %v767_v38 }
 0x3d5   : > { %741 = vrot.lane.b32.xlu0 %v737_v36, %s1324_s11  ;;  %1153 = vpow2.f32 %v768_v39 }
 0x3d6   : > { %1155 = vlog2.f32 %v753_v44 }
 0x3df   : > { %v1154_v40 = vpop.eup %1153 }
 0x3e0   : > { %v770_v41 = vmul.f32 2.0, %v1154_v40  ;;  %v1156_v49 = vpop.eup %1155 }
 0x3e1   : > { %v755_v51 = vmul.f32 0.6931472, %v1156_v49 }
 0x3e2   : > { %772 = vrot.lane.b32.xlu1 %v770_v41, %s1325_s18 }
 0x443   : > { %v764_v45 = vpop.permute.xlu0 %763 }
 0x444   : > { %v766_v46 = vsub.f32 %v1530_v5, %v764_v45 }
 0x447   : > { %v742_v52 = vpop.permute.xlu0 %741 }
 0x448   : > { %v744_v53 = vsel %vm493_vm7, %v742_v52, 0.0 }
 0x454   : > { %v773_v47 = vpop.permute.xlu1 %772 }
 0x455   : > { %v775_v48 = vmul.f32 %v773_v47, %v766_v46 }
 0x457   : > { %v776_v50 = vmul.f32 %v775_v48, %v775_v48 }
 0x459   : > { %778 = vrot.lane.b32.xlu1 %v776_v50, %s1322_s25 }
 0x45d   : > { %757 = vrot.lane.b32.xlu1 %v755_v51, %s1322_s25 }
 0x481   : > { %745 = vadd.xlane.f32.xlu1 %v744_v53 }
 0x4cb   : > { %v779_v56 = vpop.permute.xlu1 %778 }
 0x4cc   : > { %v781_v57 = vsel %vm493_vm7, %v779_v56, 0.0 }
 0x4cd   : > { %782 = vadd.xlane.f32.xlu0 %v781_v57 }
 0x4cf   : > { %v758_v58 = vpop.permute.xlu1 %757 }
 0x4d0   : > { %v760_v59 = vsel %vm493_vm7, %v758_v58, 0.0 }
 0x4d1   : > { %761 = vadd.xlane.f32.xlu0 %v760_v59 }
 0x50e   : > { %v746_v61 = vpop.xlane.xlu1 %745 }
 0x50f   : > { %v748_v0 = vmul.f32 0.06666667, %v746_v61 }
 0x511   : > { %v749_v4 = vadd.f32 0.72579134, %v748_v0 }
 0x55a   : > { %v783_v60 = vpop.xlane.xlu0 %782 }
 0x55b   : > { %v784_v62 = vmul.f32 -0.5, %v783_v60 }
 0x55d   : > { %v785_v63 = vsub.f32 %v784_v62, %v746_v61 }
 0x55e   : > { %v762_v1 = vpop.xlane.xlu0 %761 }
 0x55f   : > { %v1001_v2 = vadd.f32 -3.3868704, %v785_v63 }
 0x561   : > { %v787_v3 = vsub.f32 %v1001_v2, %v762_v1 }
 0x563   : > { %871 = vst.msk [vmem:[%s390_s29] sm:$0xff] %vm870_vm10, %v787_v3 }
 0x564   : > { %873 = vst.msk [vmem:[%s390_s29] sm:$0xff] %vm872_vm11, %v749_v4 }
 0x565   : > { %1254 = shalt.err (!%p1251_p11)
}
 0x566   : > { %s1255_s21 = scalar_lea.hbm %s1591_s30, 128  ;;  %s1259_s18 = scalar_lea.hbm %s1645_s10, 256 }
 0x567   : > { %p1256_p13 = scmp.ne.s32.totalorder %s1591_s30, %s1255_s21  ;;  %p1260_p6 = scmp.lt.u32.totalorder %s1591_s30, %s1645_s10 }
 0x568   : > { %p1261_p5 = scmp.lt.u32.totalorder %s1259_s18, %s1255_s21  ;;  %p1263_p9 = scmp.lt.u32.totalorder %s1255_s21, %s1591_s30 }
 0x569   : > { %p1257_p1 = pnand %p1256_p13, %p1671_p10 }
 0x56a   : > { %p1262_p12 = por %p1261_p5, %p1260_p6 }
 0x56b   : > { %p1258_p0 = pneg %p1257_p1 }
 0x56c   : > { %p1264_p2 = por %p1263_p9, %p1262_p12 }
 0x56e   : > { %p1265_p3 = pnand %p1264_p2, %p1258_p0 }
 0x570   : > { %1268 = shalt.err (!%p1265_p3)
}
 0x571   : > { %1083 = dma.vmem_to_hbm [thread:$0]  (%p1671_p10), %s1593_s24, 128, %s1591_s30, %s875_s12  }
 0x572 PF: > { %s1672_s29 = sld [smem:[#allocation15_spill]]  ;;  %p1105_p4 = scmp.ge.s32.totalorder %s1311_s16, 2 }
 0x573   : > { %s900_s19 = sand.u32 1, %s1299_s13  }
 0x574   : > { %s901_s5 = scalar_lea.sflag [#allocation4], %s900_s19 }
 0x578   : > { %p1673_p7 = scmp.ne.s32.totalorder %s1672_s29, 0 }
 0x57a   : > { %p1096_p8 = pnand %p1105_p4, %p1673_p7 }
 0x57c   : > { %1294 = dma.done.wait (!%p1096_p8), %s901_s5, 128  }
 0x57d   : > { %1296 = vsyncadd (!%p1096_p8), %s901_s5, 4294967168  ;;  %s1674_s16 = sld [smem:[#allocation13_spill]]  ;;  %s1675_s25 = sld [smem:[#allocation12_spill]] }
 0x57e   : > { %s1676_s15 = sld [smem:[#allocation14_spill]]  ;;  %s1677_s13 = smov %s1303_s14 }
 0x583   : > { %p22_p11 = scmp.ge.s32.totalorder %s1674_s16, 4   ;;  %s1678_s14 = smov %s1675_s25 }
 0x585   :  { %24 = sbr.rel (!%p22_p11) target bundleno = 7 (0x7), region = 108 }
 0x58c   :  { %906 = vsyncpa [#allocation3], 1 }
 0x58d   :  { %908 = vsyncpa [#allocation3 + $0x1], 1 }
 0x58e   :  { %909 = vsyncpa [#allocation6], 1 }
 0x58f   :  { %910 = vsyncpa [#allocation4], 1 }
 0x590   :  { %912 = vsyncpa [#allocation4 + $0x1], 1 }

</bundles_post_ra>
